<compile_context>
chip_gen: v5e
topology: v5e:2x2
jax: 0.10.0
libtpu: 0.0.40
codegen_flags: <defaults>
</compile_context>

<pallas_src>
import functools

import jax
import jax.numpy as jnp
from jax.experimental import pallas as pl
from jax.experimental.pallas import tpu as pltpu


# --------------------------------------------------------------------------
# VMEM / tiling helpers (generation-aware per perf review)
# --------------------------------------------------------------------------

_MIB = 1024 * 1024


def _vmem_capacity_bytes():
    """Physical VMEM of the current TPU; conservative fallback (v7x per-TC)."""
    try:
        return int(pltpu.get_tpu_info().vmem_capacity_bytes)
    except Exception:
        return 64 * _MIB


def _pick_row_tile(n, c, in_itemsize, vmem_cap):
    """Row tile sized so the pipeline buffers AND the in-kernel temporaries fit.

    Per-row VMEM cost:
      * 2 logits inputs x 2 pipeline buffers x C x input-itemsize
      * ~8 full-width (row_tile, C) f32 temporaries (z1,z2,e1,e2,p1,p2,d,sel)
        that Mosaic keeps live in scratch.
    """
    headroom = 8 * _MIB            # compiler scratch / safety margin
    slack = 4 * _MIB               # labels block(s), output, control
    usable = max(2 * _MIB, vmem_cap - headroom - slack)

    per_row = c * (4 * in_itemsize + 8 * 4)
    tile_mult = 16 if in_itemsize < 4 else 8          # bf16 packs (16,128)/vreg
    max_rows = 4096 if c <= 256 else 2048             # keep >=~2 MiB per block

    tn = int(usable // per_row)
    tn = max(tile_mult, min(max_rows, (tn // tile_mult) * tile_mult))
    if n <= tn:
        return n                   # single full-dim block (no padding at all)
    return tn


# --------------------------------------------------------------------------
# Kernel
# --------------------------------------------------------------------------

def rdrop_kernel(l1_ref, l2_ref, lab_ref, out_ref, *,
                 alpha, n_rows, row_tile, tiles_per_core, labels_resident):
    core = pl.program_id(0)
    step = pl.program_id(1)

    # Resident (1, 1) accumulator per core: zero at the first tile of the core.
    @pl.when(step == 0)
    def _():
        out_ref[...] = jnp.zeros_like(out_ref)

    l1 = l1_ref[...].astype(jnp.float32)          # (TN, C)
    l2 = l2_ref[...].astype(jnp.float32)          # (TN, C)
    tn, c = l1.shape

    # Logical (un-clamped) tile index; the DMA'd block may be a clamped
    # duplicate for over-covering grid steps -- those rows are masked below.
    tile_idx = core * tiles_per_core + step
    row_start = tile_idx * row_tile

    if labels_resident:
        start = row_start
        if row_tile % 8 == 0:
            start = pl.multiple_of(start, 8)      # aligned sublane slice
        labels = lab_ref[pl.ds(start, row_tile), :]          # (TN, 1) int32
    else:
        labels = lab_ref[...]                                 # (TN, 1) int32

    # Shared-exp softmax pieces; log-softmax is never materialized full-width.
    m1 = jnp.max(l1, axis=-1, keepdims=True)
    m2 = jnp.max(l2, axis=-1, keepdims=True)
    z1 = l1 - m1
    z2 = l2 - m2
    e1 = jnp.exp(z1)                              # one EUP exp per element
    e2 = jnp.exp(z2)
    s1 = jnp.sum(e1, axis=-1, keepdims=True)      # (TN, 1)
    s2 = jnp.sum(e2, axis=-1, keepdims=True)
    logs1 = jnp.log(s1)
    logs2 = jnp.log(s2)

    # Per-row reciprocal (TN elems) instead of a full-width (TN, C) divide;
    # pl.reciprocal(s, approx=True) could push it onto the EUP slot but the
    # narrow exact divide is already negligible and keeps f32 accuracy.
    p1 = e1 * (1.0 / s1)
    p2 = e2 * (1.0 / s2)

    # Symmetric KL: 0.5*(p2*(ls2-ls1) + p1*(ls1-ls2)) == 0.5*(p1-p2)*(ls1-ls2);
    # ls1-ls2 computed without materializing either log-softmax.
    d = (z1 - z2) - (logs1 - logs2)
    kl_row = jnp.sum((p1 - p2) * d, axis=-1, keepdims=True)          # (TN, 1)

    # CE: pick z at the label column (no one-hot cast / multiply); the per-row
    # logS correction and all scalar factors are applied on the (TN,1) sums.
    col = jax.lax.broadcasted_iota(jnp.int32, (tn, c), 1)
    picked = jnp.sum(jnp.where(col == labels, z1 + z2, 0.0),
                     axis=-1, keepdims=True)                          # (TN, 1)

    row_val = (0.5 * alpha) * kl_row \
        + (0.5 / n_rows) * ((logs1 + logs2) - picked)

    # Mask rows past the real N (tile tail padding / clamped duplicate tiles);
    # select drops any garbage / NaN from padded regions.
    row_idx = jax.lax.broadcasted_iota(jnp.int32, (tn, 1), 0) + row_start
    row_val = jnp.where(row_idx < n_rows, row_val, 0.0)

    out_ref[...] += jnp.sum(row_val, axis=0, keepdims=True)          # (1, 1)


# --------------------------------------------------------------------------
# Wrapper
# --------------------------------------------------------------------------

def rdrop_loss(logits1, logits2, labels, alpha=1.0, row_tile=None,
               num_cores=2, labels_resident=None):
    n, c = logits1.shape
    assert logits2.shape == (n, c)
    in_itemsize = jnp.dtype(logits1.dtype).itemsize

    vmem_cap = _vmem_capacity_bytes()
    if row_tile is None:
        row_tile = _pick_row_tile(n, c, in_itemsize, vmem_cap)

    num_tiles = pl.cdiv(n, row_tile)
    num_cores = max(1, min(num_cores, num_tiles))      # no wasted steps if tiny
    tiles_per_core = pl.cdiv(num_tiles, num_cores)
    n_padded = num_cores * tiles_per_core * row_tile
    last_tile = num_tiles - 1

    # Clamp logits block index for over-covering grid steps (odd tile counts);
    # the duplicated rows are masked inside the kernel.
    def tile_map(cc, ii):
        return (jnp.minimum(cc * tiles_per_core + ii, last_tile), 0)

    labels_i32 = labels.astype(jnp.int32)
    if labels_resident is None:
        # Resident labels: one DMA for the whole run (N*512 B in VMEM due to
        # 128-lane padding) -- only when that stays small.
        labels_resident = n_padded <= 4096
    if labels_resident:
        lab = jnp.pad(labels_i32, (0, n_padded - n)).reshape(n_padded, 1)
        lab_spec = pl.BlockSpec((n_padded, 1), lambda cc, ii: (0, 0))
    else:
        lab = labels_i32.reshape(n, 1)
        lab_spec = pl.BlockSpec((row_tile, 1), tile_map)

    # Generation-aware VMEM limit: physical capacity minus headroom (never the
    # old 100 MiB cap, which is unsatisfiable on 64 MiB v7x parts).
    vmem_limit = int(max(16 * _MIB, vmem_cap - 8 * _MIB))

    cost = pl.CostEstimate(
        flops=14 * n * c,
        transcendentals=2 * n * c,
        bytes_accessed=2 * n * c * in_itemsize + n * 4 + num_cores * 4,
    )

    kernel = functools.partial(
        rdrop_kernel,
        alpha=float(alpha),
        n_rows=n,
        row_tile=row_tile,
        tiles_per_core=tiles_per_core,
        labels_resident=labels_resident,
    )

    out = pl.pallas_call(
        kernel,
        grid=(num_cores, tiles_per_core),
        in_specs=[
            pl.BlockSpec((row_tile, c), tile_map),
            pl.BlockSpec((row_tile, c), tile_map),
            lab_spec,
        ],
        out_specs=pl.BlockSpec((1, 1), lambda cc, ii: (cc, 0)),
        out_shape=jax.ShapeDtypeStruct((num_cores, 1), jnp.float32),
        compiler_params=pltpu.CompilerParams(
            dimension_semantics=("parallel", "arbitrary"),
            vmem_limit_bytes=vmem_limit,
        ),
        cost_estimate=cost,
    )(logits1, logits2, lab)

    return jnp.sum(out)          # combine per-core partial sums


def rdrop_loss_ref(logits1, logits2, labels, alpha=1.0):
    """Pure-JAX reference for correctness checking (masks=None path)."""
    ls1 = jax.nn.log_softmax(logits1.astype(jnp.float32), axis=-1)
    ls2 = jax.nn.log_softmax(logits2.astype(jnp.float32), axis=-1)
    p1, p2 = jnp.exp(ls1), jnp.exp(ls2)
    onehot = jax.nn.one_hot(labels, logits1.shape[-1], dtype=jnp.float32)
    ce1 = -jnp.sum(onehot * ls1, axis=-1)
    ce2 = -jnp.sum(onehot * ls2, axis=-1)
    ce_loss = jnp.mean(0.5 * (ce1 + ce2))
    kl = 0.5 * (p2 * (ls2 - ls1) + p1 * (ls1 - ls2))
    return ce_loss + alpha * jnp.sum(kl)


if __name__ == "__main__":
    key = jax.random.PRNGKey(0)

    # Case 1: tiny single-tile shape (batch=8, classes=32).
    k1, k2, k3, key = jax.random.split(key, 4)
    l1 = jax.random.normal(k1, (8, 32), jnp.float32)
    l2 = jax.random.normal(k2, (8, 32), jnp.float32)
    y = jax.random.randint(k3, (8,), 0, 32, dtype=jnp.int32)
    out = rdrop_loss(l1, l2, y, alpha=1.0)
    jax.block_until_ready(out)
    ref = rdrop_loss_ref(l1, l2, y, alpha=1.0)
    assert jnp.allclose(out, ref, rtol=1e-5, atol=1e-5), (out, ref)

    # Case 2: multi-tile grid split across the core axis with a masked tail
    # (N % row_tile != 0); also exercises the per-tile-labels fallback path.
    k1, k2, k3, key = jax.random.split(key, 4)
    l1 = jax.random.normal(k1, (24, 128), jnp.float32)
    l2 = jax.random.normal(k2, (24, 128), jnp.float32)
    y = jax.random.randint(k3, (24,), 0, 128, dtype=jnp.int32)
    ref = rdrop_loss_ref(l1, l2, y, alpha=0.5)

    out = rdrop_loss(l1, l2, y, alpha=0.5, row_tile=16)
    jax.block_until_ready(out)
    assert jnp.allclose(out, ref, rtol=1e-5, atol=1e-5), (out, ref)

    out_b = rdrop_loss(l1, l2, y, alpha=0.5, row_tile=16, labels_resident=False)
    jax.block_until_ready(out_b)
    assert jnp.allclose(out_b, ref, rtol=1e-5, atol=1e-5), (out_b, ref)

    # Case 3: bf16 logits (halves HBM traffic on mem-bound v5e/v6e); kernel
    # still accumulates in f32, so it matches the f32-of-bf16 reference tightly.
    k1, k2, k3, key = jax.random.split(key, 4)
    l1 = jax.random.normal(k1, (48, 64), jnp.float32).astype(jnp.bfloat16)
    l2 = jax.random.normal(k2, (48, 64), jnp.float32).astype(jnp.bfloat16)
    y = jax.random.randint(k3, (48,), 0, 64, dtype=jnp.int32)
    out = rdrop_loss(l1, l2, y, alpha=1.0)
    jax.block_until_ready(out)
    ref = rdrop_loss_ref(l1, l2, y, alpha=1.0)
    assert jnp.allclose(out, ref, rtol=1e-4, atol=1e-4), (out, ref)

    print("KERNEL_OK")
</pallas_src>

<mosaic_0001>
module attributes {stable_mosaic.version = 11 : i64} {
  func.func @rdrop_kernel(%arg0: i32, %arg1: i32, %arg2: memref<8x32xf32, #tpu.memory_space<vmem>>, %arg3: memref<8x32xf32, #tpu.memory_space<vmem>>, %arg4: memref<8x1xi32, #tpu.memory_space<vmem>>, %arg5: memref<1x1xf32, #tpu.memory_space<vmem>>) attributes {dimension_semantics = [#tpu.dimension_semantics<parallel>, #tpu.dimension_semantics<arbitrary>], iteration_bounds = array<i64: 1, 1>, scalar_prefetch = 0 : i64, scratch_operands = 0 : i64, tpu.core_type = #tpu.core_type<tc>, window_params = [{transform_indices = @transform_0, window_bounds = array<i64: 8, 32>}, {transform_indices = @transform_1, window_bounds = array<i64: 8, 32>}, {pipeline_mode = #tpu.pipeline_mode<synchronous>, transform_indices = @transform_2, window_bounds = array<i64: 8, 1>}, {transform_indices = @transform_3, window_bounds = array<i64: 1, 1>}]} {
    %c0_i32 = arith.constant 0 : i32
    %0 = arith.cmpi eq, %arg1, %c0_i32 : i32
    %1 = arith.extui %0 : i1 to i32
    %c0_i32_0 = arith.constant 0 : i32
    %2 = arith.cmpi ne, %1, %c0_i32_0 : i32
    scf.if %2 {
      %cst_22 = arith.constant 0.000000e+00 : f32
      %70 = vector.broadcast %cst_22 : f32 to vector<1x1xf32>
      %c0_23 = arith.constant 0 : index
      %c0_24 = arith.constant 0 : index
      %71 = vector.load %arg5[%c0_23, %c0_24] : memref<1x1xf32, #tpu.memory_space<vmem>>, vector<1x1xf32>
      tpu.vector_store %arg5[%c0_23, %c0_24], %70 {strides = array<i32>} : memref<1x1xf32, #tpu.memory_space<vmem>>, vector<1x1xf32>,
    } else {
    }
    %c0 = arith.constant 0 : index
    %c0_1 = arith.constant 0 : index
    %3 = vector.load %arg2[%c0, %c0_1] : memref<8x32xf32, #tpu.memory_space<vmem>>, vector<8x32xf32>
    %c0_2 = arith.constant 0 : index
    %c0_3 = arith.constant 0 : index
    %4 = vector.load %arg3[%c0_2, %c0_3] : memref<8x32xf32, #tpu.memory_space<vmem>>, vector<8x32xf32>
    %c1_i32 = arith.constant 1 : i32
    %5 = arith.muli %arg0, %c1_i32 : i32
    %6 = arith.addi %5, %arg1 : i32
    %c8_i32 = arith.constant 8 : i32
    %7 = arith.muli %6, %c8_i32 : i32
    %8 = tpu.assume_multiple %7, 8 : i32
    %9 = arith.index_cast %8 : i32 to index
    %c0_4 = arith.constant 0 : index
    %10 = vector.load %arg4[%9, %c0_4] : memref<8x1xi32, #tpu.memory_space<vmem>>, vector<8x1xi32>
    %cst = arith.constant dense<0xFF800000> : vector<8xf32>
    %11 = vector.multi_reduction <maximumf>, %3, %cst [1] : vector<8x32xf32> to vector<8xf32>
    %12 = vector.shape_cast %11 : vector<8xf32> to vector<8x1xf32>
    %cst_5 = arith.constant dense<0xFF800000> : vector<8xf32>
    %13 = vector.multi_reduction <maximumf>, %4, %cst_5 [1] : vector<8x32xf32> to vector<8xf32>
    %14 = vector.shape_cast %13 : vector<8xf32> to vector<8x1xf32>
    %15 = vector.broadcast %12 : vector<8x1xf32> to vector<8x32xf32>
    %16 = arith.subf %3, %15 : vector<8x32xf32>
    %17 = vector.broadcast %14 : vector<8x1xf32> to vector<8x32xf32>
    %18 = arith.subf %4, %17 : vector<8x32xf32>
    %19 = math.exp %16 : vector<8x32xf32>
    %20 = math.exp %18 : vector<8x32xf32>
    %cst_6 = arith.constant dense<0.000000e+00> : vector<8xf32>
    %21 = vector.multi_reduction <add>, %19, %cst_6 [1] : vector<8x32xf32> to vector<8xf32>
    %22 = vector.shape_cast %21 : vector<8xf32> to vector<8x1xf32>
    %cst_7 = arith.constant dense<0.000000e+00> : vector<8xf32>
    %23 = vector.multi_reduction <add>, %20, %cst_7 [1] : vector<8x32xf32> to vector<8xf32>
    %24 = vector.shape_cast %23 : vector<8xf32> to vector<8x1xf32>
    %25 = math.log %22 : vector<8x1xf32>
    %26 = math.log %24 : vector<8x1xf32>
    %cst_8 = arith.constant 1.000000e+00 : f32
    %27 = vector.broadcast %cst_8 : f32 to vector<8x1xf32>
    %28 = arith.divf %27, %22 : vector<8x1xf32>
    %29 = vector.broadcast %28 : vector<8x1xf32> to vector<8x32xf32>
    %30 = arith.mulf %19, %29 : vector<8x32xf32>
    %cst_9 = arith.constant 1.000000e+00 : f32
    %31 = vector.broadcast %cst_9 : f32 to vector<8x1xf32>
    %32 = arith.divf %31, %24 : vector<8x1xf32>
    %33 = vector.broadcast %32 : vector<8x1xf32> to vector<8x32xf32>
    %34 = arith.mulf %20, %33 : vector<8x32xf32>
    %35 = arith.subf %16, %18 : vector<8x32xf32>
    %36 = arith.subf %25, %26 : vector<8x1xf32>
    %37 = vector.broadcast %36 : vector<8x1xf32> to vector<8x32xf32>
    %38 = arith.subf %35, %37 : vector<8x32xf32>
    %39 = arith.subf %30, %34 : vector<8x32xf32>
    %40 = arith.mulf %39, %38 : vector<8x32xf32>
    %cst_10 = arith.constant dense<0.000000e+00> : vector<8xf32>
    %41 = vector.multi_reduction <add>, %40, %cst_10 [1] : vector<8x32xf32> to vector<8xf32>
    %42 = vector.shape_cast %41 : vector<8xf32> to vector<8x1xf32>
    %43 = tpu.iota {dimensions = array<i32: 1>} : vector<8x32xi32>
    %44 = vector.broadcast %10 : vector<8x1xi32> to vector<8x32xi32>
    %45 = arith.cmpi eq, %43, %44 : vector<8x32xi32>
    %46 = arith.addf %16, %18 : vector<8x32xf32>
    %cst_11 = arith.constant 0.000000e+00 : f32
    %47 = vector.broadcast %cst_11 : f32 to vector<8x32xf32>
    %48 = arith.select %45, %46, %47 : vector<8x32xi1>, vector<8x32xf32>
    %cst_12 = arith.constant dense<0.000000e+00> : vector<8xf32>
    %49 = vector.multi_reduction <add>, %48, %cst_12 [1] : vector<8x32xf32> to vector<8xf32>
    %50 = vector.shape_cast %49 : vector<8xf32> to vector<8x1xf32>
    %cst_13 = arith.constant 5.000000e-01 : f32
    %51 = vector.broadcast %cst_13 : f32 to vector<8x1xf32>
    %52 = arith.mulf %51, %42 : vector<8x1xf32>
    %53 = arith.addf %25, %26 : vector<8x1xf32>
    %54 = arith.subf %53, %50 : vector<8x1xf32>
    %cst_14 = arith.constant 6.250000e-02 : f32
    %55 = vector.broadcast %cst_14 : f32 to vector<8x1xf32>
    %56 = arith.mulf %55, %54 : vector<8x1xf32>
    %57 = arith.addf %52, %56 : vector<8x1xf32>
    %58 = tpu.iota {dimensions = array<i32: 0>} : vector<8x1xi32>
    %59 = vector.broadcast %7 : i32 to vector<8x1xi32>
    %60 = arith.addi %58, %59 : vector<8x1xi32>
    %c8_i32_15 = arith.constant 8 : i32
    %61 = vector.broadcast %c8_i32_15 : i32 to vector<8x1xi32>
    %62 = arith.cmpi slt, %60, %61 : vector<8x1xi32>
    %cst_16 = arith.constant 0.000000e+00 : f32
    %63 = vector.broadcast %cst_16 : f32 to vector<8x1xf32>
    %64 = arith.select %62, %57, %63 : vector<8x1xi1>, vector<8x1xf32>
    %c0_17 = arith.constant 0 : index
    %c0_18 = arith.constant 0 : index
    %65 = vector.load %arg5[%c0_17, %c0_18] : memref<1x1xf32, #tpu.memory_space<vmem>>, vector<1x1xf32>
    %cst_19 = arith.constant dense<0.000000e+00> : vector<1xf32>
    %66 = vector.multi_reduction <add>, %64, %cst_19 [0] : vector<8x1xf32> to vector<1xf32>
    %67 = vector.shape_cast %66 : vector<1xf32> to vector<1x1xf32>
    %68 = arith.addf %65, %67 : vector<1x1xf32>
    %c0_20 = arith.constant 0 : index
    %c0_21 = arith.constant 0 : index
    %69 = vector.load %arg5[%c0_20, %c0_21] : memref<1x1xf32, #tpu.memory_space<vmem>>, vector<1x1xf32>
    tpu.vector_store %arg5[%c0_20, %c0_21], %68 {strides = array<i32>} : memref<1x1xf32, #tpu.memory_space<vmem>>, vector<1x1xf32>,
    return
  }
  func.func @transform_0(%arg0: i32, %arg1: i32) -> (i32, i32) {
    %c1_i32 = arith.constant 1 : i32
    %0 = arith.muli %arg0, %c1_i32 : i32
    %1 = arith.addi %0, %arg1 : i32
    %c0_i32 = arith.constant 0 : i32
    %2 = arith.minsi %1, %c0_i32 : i32
    %c0_i32_0 = arith.constant 0 : i32
    %c0_i32_1 = arith.constant 0 : i32
    return %2, %c0_i32_0 : i32, i32
  }
  func.func @transform_1(%arg0: i32, %arg1: i32) -> (i32, i32) {
    %c1_i32 = arith.constant 1 : i32
    %0 = arith.muli %arg0, %c1_i32 : i32
    %1 = arith.addi %0, %arg1 : i32
    %c0_i32 = arith.constant 0 : i32
    %2 = arith.minsi %1, %c0_i32 : i32
    %c0_i32_0 = arith.constant 0 : i32
    %c0_i32_1 = arith.constant 0 : i32
    return %2, %c0_i32_0 : i32, i32
  }
  func.func @transform_2(%arg0: i32, %arg1: i32) -> (i32, i32) {
    %c0_i32 = arith.constant 0 : i32
    %c0_i32_0 = arith.constant 0 : i32
    %c0_i32_1 = arith.constant 0 : i32
    return %c0_i32, %c0_i32_0 : i32, i32
  }
  func.func @transform_3(%arg0: i32, %arg1: i32) -> (i32, i32) {
    %c0_i32 = arith.constant 0 : i32
    %c0_i32_0 = arith.constant 0 : i32
    return %arg0, %c0_i32 : i32, i32
  }
}

</mosaic_0001>

<bundles_post_ra>
// kernel: tpu_custom_call.1
= control target key start
LH: loop header
LB: loop body
LE: loop exit
PB: predicated region body
PF: predicated region fallthrough
CT: control target
= control target key end

     0   :  { %8 = vsyncpa [#allocation3], 0  ;;  %s315_s0 = inlined_call_operand.vmem [shape: f32[8,32], index: 0, kind: input, shape index: {}]   ;;  %s316_s1 = inlined_call_operand.hbm [shape: f32[8,32], index: 1, kind: input, shape index: {}]   ;;  %s317_s2 = inlined_call_operand.vmem [shape: s32[8,1], index: 2, kind: input, shape index: {}]   ;;  %s318_s3 = inlined_call_operand.hbm [shape: f32[1,1], index: 3, kind: output, shape index: {}]  }
   0x1   :  { %9 = vsyncpa [#allocation4], 0  ;;  %s32_s14 = sshll.u32 %s316_s1, 4  ;;  %s266_s15 = smov [#allocation2]   ;;  %s33_s14 = int_to_ptr.hbm [resolvable:$true] %s32_s14 }
   0x2   :  { %s34_s16 = sshll.u32 %s266_s15, 4  ;;  %s35_s16 = int_to_ptr.vmem [resolvable:$true] %s34_s16 }
   0x3   :  { %37 = dma.hbm_to_vmem [thread:$0]  %s33_s14, 128, %s35_s16, [#allocation3]  }
   0x4   :  { %262 = dma.done.wait [#allocation3], 128  }
   0x5   :  { %263 = vsyncadd [#allocation3], 4294967168  ;;  %vm68_vm0 = vcmask 0   ;;  %v267_v0 = vmov 0.0   ;;  %v268_v1 = vmov 0   ;;  %vm76_vm1 = vcmask 261120  }
   0x6   :  { %69 = vst.msk [vmem:[#allocation5] sm:$0x1] %vm68_vm0, %v267_v0  ;;  %200 = vset.pattern.permute.xlu2 %v268_v1  ;;  %201 = vset.pattern.permute.xlu0 %v268_v1  ;;  %v70_v2 = vld [vmem:[%s315_s0] sm:$0xff]  ;;  %v139_v9 = vlaneseq  ;;  %s269_s0 = smov [#allocation5]   ;;  %s178_s22 = sshll.u32 %s318_s3, 4  ;;  %s179_s22 = int_to_ptr.hbm [resolvable:$true] %s178_s22 }
   0x7   :  { %v75_v3 = vld [vmem:[%s317_s2] sm:$0xff]  ;;  %v77_v4 = vsel %vm76_vm1, %v70_v2, -inf  ;;  %s176_s2 = sshll.u32 %s269_s0, 4  ;;  %s177_s2 = int_to_ptr.vmem [resolvable:$true] %s176_s2 }
   0x8   :  { %142 = vperm.xlu2 %200, %v75_v3   ;;  %78 = vmax.xlane.f32.xlu0 %v77_v4  ;;  %v71_v5 = vld [vmem:[#allocation2] sm:$0xff]  ;;  %v140_v11 = vand.u32 127, %v139_v9 }
   0x9   :  { %v80_v6 = vsel %vm76_vm1, %v71_v5, -inf }
  0x10   :  { %81 = vmax.xlane.f32.xlu0 %v80_v6 }
  0x62   :  { %v143_v12 = vpop.permute.xlu2 %142 }
  0x63   :  { %vm144_vm2 = vcmp.eq.s32.totalorder %v140_v11, %v143_v12 }
  0x7b   :  { %v79_v7 = vpop.xlane.xlu0 %78 }
  0x7c   :  { %v302_v8 = vsub.f32 %v70_v2, %v79_v7 }
  0x7e   :  { %v85_v10 = vmul.f32 1.442695, %v302_v8 }
  0x80   :  { %202 = vpow2.f32 %v85_v10 }
  0x83   :  { %v82_v13 = vpop.xlane.xlu0 %81 }
  0x84   :  { %v84_v14 = vsub.f32 %v71_v5, %v82_v13  ;;  %v161_v5 = vld [vmem:[#allocation5] sm:$0x1] }
  0x86   :  { %v203_v15 = vpop.eup %202  ;;  %v87_v16 = vmul.f32 1.442695, %v84_v14  ;;  %v131_v17 = vsub.f32 %v302_v8, %v84_v14  ;;  %v145_v18 = vadd.f32 %v84_v14, %v302_v8 }
  0x87   :  { %v89_v19 = vsel %vm76_vm1, %v203_v15, 0.0 }
  0x88   :  { %204 = vpow2.f32 %v87_v16  ;;  %90 = vadd.xlane.f32.xlu1 %v89_v19  ;;  %v146_v20 = vsel %vm144_vm2, %v145_v18, 0.0 }
  0x89   :  { %v147_v21 = vsel %vm76_vm1, %v146_v20, 0.0 }
  0x8a   :  { %148 = vadd.xlane.f32.xlu2 %v147_v21 }
  0x8e   :  { %v205_v22 = vpop.eup %204 }
  0x8f   :  { %v92_v23 = vsel %vm76_vm1, %v205_v22, 0.0 }
  0x90   :  { %93 = vadd.xlane.f32.xlu1 %v92_v23 }
  0xfb   :  { %v91_v24 = vpop.xlane.xlu1 %90 }
  0xfc   :  { %206 = vrcp.f32 %v91_v24  ;;  %v110_v37 = vand.u32 2147483648, %v91_v24  ;;  %vm104_vm4 = vweird.f32 %v91_v24  ;;  %v108_v40 = vand.u32 2147483647, %v91_v24 }
  0xfd   :  { %208 = vlog2.f32 %v91_v24  ;;  %v149_v58 = vpop.xlane.xlu2 %148 }
  0xfe   :  { %v111_v45 = vor.u32 1.1754944e-38, %v110_v37  ;;  %vm109_vm8 = vcmp.eq.f32.partialorder %v108_v40, 8.507059e+37 }
 0x102   :  { %v207_v25 = vpop.eup %206 }
 0x103   :  { %v100_v26 = vmul.f32 %v207_v25, %v91_v24  ;;  %v94_v27 = vpop.xlane.xlu1 %93  ;;  %v209_v29 = vpop.eup %208  ;;  %vm105_vm3 = vweird.f32 %v207_v25 }
 0x104   :  { %210 = vlog2.f32 %v94_v27  ;;  %v96_v33 = vmul.f32 0.6931472, %v209_v29  ;;  %v126_v41 = vand.u32 2147483648, %v94_v27  ;;  %vm106_vm5 = vmor %vm104_vm4, %vm105_vm3  ;;  %v124_v43 = vand.u32 2147483647, %v94_v27 }
 0x105   :  { %v101_v28 = vsub.f32 1.0, %v100_v26  ;;  %212 = vrcp.f32 %v94_v27  ;;  %vm120_vm7 = vweird.f32 %v94_v27 }
 0x106   :  { %v127_v47 = vor.u32 1.1754944e-38, %v126_v41  ;;  %vm125_vm10 = vcmp.eq.f32.partialorder %v124_v43, 8.507059e+37 }
 0x107   :  { %v102_v30 = vmul.f32 %v207_v25, %v101_v28 }
 0x109   :  { %v103_v36 = vadd.f32 %v207_v25, %v102_v30 }
 0x10a   :  { %v211_v31 = vpop.eup %210 }
 0x10b   :  { %v213_v32 = vpop.eup %212  ;;  %v98_v34 = vmul.f32 0.6931472, %v211_v31  ;;  %v107_v44 = vsel %vm106_vm5, %v207_v25, %v103_v36 }
 0x10c   :  { %v116_v35 = vmul.f32 %v213_v32, %v94_v27  ;;  %vm121_vm6 = vweird.f32 %v213_v32  ;;  %v112_v48 = vsel %vm109_vm8, %v111_v45, %v107_v44 }
 0x10d   :  { %v151_v38 = vadd.f32 %v98_v34, %v96_v33  ;;  %vm122_vm9 = vmor %vm120_vm7, %vm121_vm6  ;;  %v132_v50 = vsub.f32 %v96_v33, %v98_v34  ;;  %v114_v52 = vmul.f32 %v203_v15, %v112_v48 }
 0x10e   :  { %v117_v39 = vsub.f32 1.0, %v116_v35 }
 0x10f   :  { %v133_v54 = vsub.f32 %v131_v17, %v132_v50  ;;  %v152_v59 = vsub.f32 %v151_v38, %v149_v58 }
 0x110   :  { %v118_v42 = vmul.f32 %v213_v32, %v117_v39 }
 0x111   :  { %v153_v61 = vmul.f32 0.0625, %v152_v59 }
 0x112   :  { %v119_v46 = vadd.f32 %v213_v32, %v118_v42 }
 0x114   :  { %v123_v49 = vsel %vm122_vm9, %v213_v32, %v119_v46 }
 0x115   :  { %v128_v51 = vsel %vm125_vm10, %v127_v47, %v123_v49 }
 0x116   :  { %v130_v53 = vmul.f32 %v205_v22, %v128_v51 }
 0x118   :  { %v134_v55 = vsub.f32 %v114_v52, %v130_v53 }
 0x11a   :  { %v135_v56 = vmul.f32 %v134_v55, %v133_v54 }
 0x11c   :  { %v136_v57 = vsel %vm76_vm1, %v135_v56, 0.0 }
 0x11d   :  { %137 = vadd.xlane.f32.xlu0 %v136_v57 }
 0x190   :  { %v138_v60 = vpop.xlane.xlu0 %137 }
 0x191   :  { %v150_v62 = vmul.f32 0.5, %v138_v60 }
 0x193   :  { %v154_v63 = vadd.f32 %v153_v61, %v150_v62 }
 0x195   :  { %v162_v0 = vrot.slane %v154_v63, 4 }
 0x197   :  { %v163_v1 = vadd.f32 %v162_v0, %v154_v63 }
 0x199   :  { %v164_v2 = vrot.slane %v163_v1, 2 }
 0x19b   :  { %v165_v3 = vadd.f32 %v164_v2, %v163_v1 }
 0x19d   :  { %v166_v4 = vrot.slane %v165_v3, 1 }
 0x19f   :  { %v167_v6 = vadd.f32 %v166_v4, %v165_v3 }
 0x1a1   :  { %v168_v7 = vadd.f32 %v167_v6, %v161_v5 }
 0x1a3   :  { %170 = vst.msk [vmem:[#allocation5] sm:$0x1] %vm68_vm0, %v168_v7 }
 0x1a4   :  { %181 = dma.vmem_to_hbm [thread:$0]  %s177_s2, 16, %s179_s22, [#allocation4]  }
 0x1a5   :  { %264 = dma.done.wait [#allocation4], 16  }
 0x1a6   :  { %265 = vsyncadd [#allocation4], 4294967280 }
 0x1a7   :  { %186 = vsyncpa [#allocation3], 1 }
 0x1a8   :  { %187 = vsyncpa [#allocation4], 1 }

</bundles_post_ra>
